<compile_context>
chip_gen: v5e
topology: v5e:2x2
jax: 0.10.0
libtpu: 0.0.40
codegen_flags: <defaults>
</compile_context>

<pallas_src>
import jax
import jax.numpy as jnp
from jax.experimental import pallas as pl
from jax.experimental.pallas import tpu as pltpu


def _round_up(n, m):
    return ((n + m - 1) // m) * m


def xor_mlp_kernel(params_ref, x_ref, o_ref):
    # params_ref: SMEM f32[17] = [w1 (4x2 row-major) | b1 (4) | w2 (4) | b2 (1)]
    # x_ref: VMEM (2, TB)   o_ref: VMEM (1, TB)   -- batch on lanes.
    x0 = x_ref[0:1, :]  # (1, TB)
    x1 = x_ref[1:2, :]  # (1, TB)

    z = jnp.zeros_like(x0)
    # fc1 row j (+ ReLU) fused directly into the fc2 accumulation.
    for j in range(4):
        h = params_ref[2 * j] * x0 + params_ref[2 * j + 1] * x1 + params_ref[8 + j]
        h = jnp.maximum(h, 0.0)
        z = z + params_ref[12 + j] * h
    z = z + params_ref[16]  # fc2 bias

    # sigmoid: exp on the EUP, exact reciprocal (keeps 1e-5 tolerance).
    o_ref[...] = pl.reciprocal(1.0 + jnp.exp(-z), approx=False)


def xor_model_forward(x, w1, b1, w2, b2, *, tile_b=1024):
    """x: (B, 2) float32; w1: (4, 2); b1: (4,); w2: (1, 4); b2: (1,) — PyTorch layout."""
    x = jnp.asarray(x, jnp.float32)
    B = x.shape[0]

    # One flat SMEM parameter block (17 scalars).
    params = jnp.concatenate([
        jnp.asarray(w1, jnp.float32).reshape(-1),   # 8
        jnp.asarray(b1, jnp.float32).reshape(-1),   # 4
        jnp.asarray(w2, jnp.float32).reshape(-1),   # 4
        jnp.asarray(b2, jnp.float32).reshape(-1),   # 1
    ])

    # Batch-on-lanes layout, padded to a lane-dense (multiple of 128) tile.
    TB = min(tile_b, _round_up(B, 128))
    Bp = _round_up(B, TB)
    x_t = jnp.zeros((2, Bp), jnp.float32).at[:, :B].set(x.T)

    out_t = pl.pallas_call(
        xor_mlp_kernel,
        out_shape=jax.ShapeDtypeStruct((1, Bp), jnp.float32),
        grid=(Bp // TB,),
        in_specs=[
            pl.BlockSpec(memory_space=pltpu.MemorySpace.SMEM),   # params, whole array
            pl.BlockSpec((2, TB), lambda i: (0, i)),             # x tile (lane-dense)
        ],
        out_specs=pl.BlockSpec((1, TB), lambda i: (0, i)),       # lane-dense output
        compiler_params=pltpu.CompilerParams(
            dimension_semantics=("parallel",),                   # megacore on v7x
        ),
    )(params, x_t)

    return out_t[0, :B].reshape(B, 1)


def _init_params(key):
    """Deterministic init mirroring nn.Linear default (U[-1/sqrt(fan_in), 1/sqrt(fan_in)])."""
    k1, k2, k3, k4 = jax.random.split(key, 4)
    bound1 = 1.0 / jnp.sqrt(2.0)
    bound2 = 1.0 / jnp.sqrt(4.0)
    w1 = jax.random.uniform(k1, (4, 2), jnp.float32, -bound1, bound1)   # fc1.weight
    b1 = jax.random.uniform(k2, (4,), jnp.float32, -bound1, bound1)     # fc1.bias
    w2 = jax.random.uniform(k3, (1, 4), jnp.float32, -bound2, bound2)   # fc2.weight
    b2 = jax.random.uniform(k4, (1,), jnp.float32, -bound2, bound2)     # fc2.bias
    return w1, b1, w2, b2


def _reference(x, w1, b1, w2, b2):
    h = jnp.maximum(x @ w1.T + b1, 0.0)
    return jax.nn.sigmoid(h @ w2.T + b2)


if __name__ == "__main__":
    key = jax.random.PRNGKey(0)
    k_x, k_p, k_big = jax.random.split(key, 3)

    w1, b1, w2, b2 = _init_params(k_p)

    # Small XOR-sized batch (matches the module's intended use).
    batch = 8
    x = jax.random.uniform(k_x, (batch, 2), jnp.float32)
    out = jax.block_until_ready(xor_model_forward(x, w1, b1, w2, b2))
    assert out.shape == (batch, 1)
    assert jnp.allclose(out, _reference(x, w1, b1, w2, b2), atol=1e-5), "mismatch (B=8)"

    # Larger batch to exercise the batch grid + padding path (grid=(2,)).
    big_batch = 2000
    xb = jax.random.uniform(k_big, (big_batch, 2), jnp.float32)
    out_b = jax.block_until_ready(xor_model_forward(xb, w1, b1, w2, b2))
    assert out_b.shape == (big_batch, 1)
    assert jnp.allclose(out_b, _reference(xb, w1, b1, w2, b2), atol=1e-5), "mismatch (B=2000)"

    print("KERNEL_OK")
</pallas_src>

<mosaic_0001>
module attributes {stable_mosaic.version = 11 : i64} {
  func.func @xor_mlp_kernel(%arg0: i32, %arg1: memref<17xf32, #tpu.memory_space<smem>>, %arg2: memref<2x128xf32, #tpu.memory_space<vmem>>, %arg3: memref<1x128xf32, #tpu.memory_space<vmem>>) attributes {dimension_semantics = [#tpu.dimension_semantics<parallel>], iteration_bounds = array<i64: 1>, scalar_prefetch = 0 : i64, scratch_operands = 0 : i64, tpu.core_type = #tpu.core_type<tc>, window_params = [{transform_indices = @transform_0, window_bounds = array<i64: 17>}, {transform_indices = @transform_1, window_bounds = array<i64: 2, 128>}, {transform_indices = @transform_2, window_bounds = array<i64: 1, 128>}]} {
    %c0 = arith.constant 0 : index
    %c0_0 = arith.constant 0 : index
    %0 = vector.load %arg2[%c0, %c0_0] : memref<2x128xf32, #tpu.memory_space<vmem>>, vector<1x128xf32>
    %c1 = arith.constant 1 : index
    %c0_1 = arith.constant 0 : index
    %1 = vector.load %arg2[%c1, %c0_1] : memref<2x128xf32, #tpu.memory_space<vmem>>, vector<1x128xf32>
    %cst = arith.constant 0.000000e+00 : f32
    %2 = vector.broadcast %cst : f32 to vector<1x128xf32>
    %c0_2 = arith.constant 0 : index
    %3 = memref.load %arg1[%c0_2] : memref<17xf32, #tpu.memory_space<smem>>
    %4 = vector.broadcast %3 : f32 to vector<1x128xf32>
    %5 = arith.mulf %4, %0 : vector<1x128xf32>
    %c1_3 = arith.constant 1 : index
    %6 = memref.load %arg1[%c1_3] : memref<17xf32, #tpu.memory_space<smem>>
    %7 = vector.broadcast %6 : f32 to vector<1x128xf32>
    %8 = arith.mulf %7, %1 : vector<1x128xf32>
    %9 = arith.addf %5, %8 : vector<1x128xf32>
    %c8 = arith.constant 8 : index
    %10 = memref.load %arg1[%c8] : memref<17xf32, #tpu.memory_space<smem>>
    %11 = vector.broadcast %10 : f32 to vector<1x128xf32>
    %12 = arith.addf %9, %11 : vector<1x128xf32>
    %cst_4 = arith.constant 0.000000e+00 : f32
    %13 = vector.broadcast %cst_4 : f32 to vector<1x128xf32>
    %14 = arith.maximumf %12, %13 : vector<1x128xf32>
    %c12 = arith.constant 12 : index
    %15 = memref.load %arg1[%c12] : memref<17xf32, #tpu.memory_space<smem>>
    %16 = vector.broadcast %15 : f32 to vector<1x128xf32>
    %17 = arith.mulf %16, %14 : vector<1x128xf32>
    %18 = arith.addf %2, %17 : vector<1x128xf32>
    %c2 = arith.constant 2 : index
    %19 = memref.load %arg1[%c2] : memref<17xf32, #tpu.memory_space<smem>>
    %20 = vector.broadcast %19 : f32 to vector<1x128xf32>
    %21 = arith.mulf %20, %0 : vector<1x128xf32>
    %c3 = arith.constant 3 : index
    %22 = memref.load %arg1[%c3] : memref<17xf32, #tpu.memory_space<smem>>
    %23 = vector.broadcast %22 : f32 to vector<1x128xf32>
    %24 = arith.mulf %23, %1 : vector<1x128xf32>
    %25 = arith.addf %21, %24 : vector<1x128xf32>
    %c9 = arith.constant 9 : index
    %26 = memref.load %arg1[%c9] : memref<17xf32, #tpu.memory_space<smem>>
    %27 = vector.broadcast %26 : f32 to vector<1x128xf32>
    %28 = arith.addf %25, %27 : vector<1x128xf32>
    %cst_5 = arith.constant 0.000000e+00 : f32
    %29 = vector.broadcast %cst_5 : f32 to vector<1x128xf32>
    %30 = arith.maximumf %28, %29 : vector<1x128xf32>
    %c13 = arith.constant 13 : index
    %31 = memref.load %arg1[%c13] : memref<17xf32, #tpu.memory_space<smem>>
    %32 = vector.broadcast %31 : f32 to vector<1x128xf32>
    %33 = arith.mulf %32, %30 : vector<1x128xf32>
    %34 = arith.addf %18, %33 : vector<1x128xf32>
    %c4 = arith.constant 4 : index
    %35 = memref.load %arg1[%c4] : memref<17xf32, #tpu.memory_space<smem>>
    %36 = vector.broadcast %35 : f32 to vector<1x128xf32>
    %37 = arith.mulf %36, %0 : vector<1x128xf32>
    %c5 = arith.constant 5 : index
    %38 = memref.load %arg1[%c5] : memref<17xf32, #tpu.memory_space<smem>>
    %39 = vector.broadcast %38 : f32 to vector<1x128xf32>
    %40 = arith.mulf %39, %1 : vector<1x128xf32>
    %41 = arith.addf %37, %40 : vector<1x128xf32>
    %c10 = arith.constant 10 : index
    %42 = memref.load %arg1[%c10] : memref<17xf32, #tpu.memory_space<smem>>
    %43 = vector.broadcast %42 : f32 to vector<1x128xf32>
    %44 = arith.addf %41, %43 : vector<1x128xf32>
    %cst_6 = arith.constant 0.000000e+00 : f32
    %45 = vector.broadcast %cst_6 : f32 to vector<1x128xf32>
    %46 = arith.maximumf %44, %45 : vector<1x128xf32>
    %c14 = arith.constant 14 : index
    %47 = memref.load %arg1[%c14] : memref<17xf32, #tpu.memory_space<smem>>
    %48 = vector.broadcast %47 : f32 to vector<1x128xf32>
    %49 = arith.mulf %48, %46 : vector<1x128xf32>
    %50 = arith.addf %34, %49 : vector<1x128xf32>
    %c6 = arith.constant 6 : index
    %51 = memref.load %arg1[%c6] : memref<17xf32, #tpu.memory_space<smem>>
    %52 = vector.broadcast %51 : f32 to vector<1x128xf32>
    %53 = arith.mulf %52, %0 : vector<1x128xf32>
    %c7 = arith.constant 7 : index
    %54 = memref.load %arg1[%c7] : memref<17xf32, #tpu.memory_space<smem>>
    %55 = vector.broadcast %54 : f32 to vector<1x128xf32>
    %56 = arith.mulf %55, %1 : vector<1x128xf32>
    %57 = arith.addf %53, %56 : vector<1x128xf32>
    %c11 = arith.constant 11 : index
    %58 = memref.load %arg1[%c11] : memref<17xf32, #tpu.memory_space<smem>>
    %59 = vector.broadcast %58 : f32 to vector<1x128xf32>
    %60 = arith.addf %57, %59 : vector<1x128xf32>
    %cst_7 = arith.constant 0.000000e+00 : f32
    %61 = vector.broadcast %cst_7 : f32 to vector<1x128xf32>
    %62 = arith.maximumf %60, %61 : vector<1x128xf32>
    %c15 = arith.constant 15 : index
    %63 = memref.load %arg1[%c15] : memref<17xf32, #tpu.memory_space<smem>>
    %64 = vector.broadcast %63 : f32 to vector<1x128xf32>
    %65 = arith.mulf %64, %62 : vector<1x128xf32>
    %66 = arith.addf %50, %65 : vector<1x128xf32>
    %c16 = arith.constant 16 : index
    %67 = memref.load %arg1[%c16] : memref<17xf32, #tpu.memory_space<smem>>
    %68 = vector.broadcast %67 : f32 to vector<1x128xf32>
    %69 = arith.addf %66, %68 : vector<1x128xf32>
    %cst_8 = arith.constant 0.000000e+00 : f32
    %70 = vector.broadcast %cst_8 : f32 to vector<1x128xf32>
    %71 = arith.subf %70, %69 : vector<1x128xf32>
    %72 = math.exp %71 : vector<1x128xf32>
    %cst_9 = arith.constant 1.000000e+00 : f32
    %73 = vector.broadcast %cst_9 : f32 to vector<1x128xf32>
    %74 = arith.addf %73, %72 : vector<1x128xf32>
    %75 = tpu.reciprocal %74 : vector<1x128xf32> -> vector<1x128xf32>
    %c0_10 = arith.constant 0 : index
    %c0_11 = arith.constant 0 : index
    %76 = vector.load %arg3[%c0_10, %c0_11] : memref<1x128xf32, #tpu.memory_space<vmem>>, vector<1x128xf32>
    tpu.vector_store %arg3[%c0_10, %c0_11], %75 {strides = array<i32>} : memref<1x128xf32, #tpu.memory_space<vmem>>, vector<1x128xf32>,
    return
  }
  func.func @transform_0(%arg0: i32) -> i32 {
    %c0_i32 = arith.constant 0 : i32
    %c0_i32_0 = arith.constant 0 : i32
    return %c0_i32 : i32
  }
  func.func @transform_1(%arg0: i32) -> (i32, i32) {
    %c0_i32 = arith.constant 0 : i32
    %c0_i32_0 = arith.constant 0 : i32
    return %c0_i32, %arg0 : i32, i32
  }
  func.func @transform_2(%arg0: i32) -> (i32, i32) {
    %c0_i32 = arith.constant 0 : i32
    %c0_i32_0 = arith.constant 0 : i32
    return %c0_i32, %arg0 : i32, i32
  }
}

</mosaic_0001>

<bundles_post_ra>
// kernel: tpu_custom_call.1
= control target key start
LH: loop header
LB: loop body
LE: loop exit
PB: predicated region body
PF: predicated region fallthrough
CT: control target
= control target key end

     0   :  { %7 = vsyncpa [#allocation5], 0  ;;  %s266_s0 = inlined_call_operand.hbm [shape: f32[17], index: 0, kind: input, shape index: {}]   ;;  %s267_s1 = inlined_call_operand.hbm [shape: f32[2,128], index: 1, kind: input, shape index: {}]   ;;  %s268_s2 = inlined_call_operand.hbm [shape: f32[1,128], index: 2, kind: output, shape index: {}]  }
   0x1   :  { %8 = vsyncpa [#allocation3], 0 }
   0x2   :  { %9 = vsyncpa [#allocation4], 0  ;;  %s15_s11 = sshll.u32 %s266_s0, 4  ;;  %s24_s14 = sshll.u32 %s267_s1, 4  ;;  %s16_s11 = int_to_ptr.hbm [resolvable:$true] %s15_s11  ;;  %s25_s14 = int_to_ptr.hbm [resolvable:$true] %s24_s14 }
   0x3   :  { %s230_s15 = smov [#allocation2]   ;;  %s231_s16 = smov [#allocation6]  }
   0x4   :  { %18 = dma.hbm_to_smem %s16_s11, 16, %s230_s15, [#allocation5]  }
   0x5   :  { %s26_s17 = sshll.u32 %s231_s16, 4  ;;  %s27_s17 = int_to_ptr.vmem [resolvable:$true] %s26_s17 }
   0x6   :  { %29 = dma.hbm_to_vmem [thread:$0]  %s25_s14, 32, %s27_s17, [#allocation3]  }
   0x7   :  { %224 = dma.done.wait [#allocation5], 16  }
   0x8   :  { %225 = vsyncadd [#allocation5], 4294967280 }
   0x9   :  { %226 = dma.done.wait [#allocation3], 32  }
   0xa   :  { %227 = vsyncadd [#allocation3], 4294967264 }
   0xb   :  { %38 = sfence }
   0xc   :  { %s41_s18 = sld [smem:[#allocation2]]  ;;  %v39_v0 = vld [vmem:[#allocation6] sm:$0x1]  ;;  %v40_v1 = vld [vmem:[#allocation6 + $0x1] sm:$0x1]  ;;  %s232_s5 = smov [#allocation7]  }
   0xd   :  { %s141_s19 = sld [smem:[#allocation2 + $0x1]]  ;;  %s128_s6 = sshll.u32 %s232_s5, 4  ;;  %s129_s6 = int_to_ptr.vmem [resolvable:$true] %s128_s6 }
   0xe   :  { %s142_s0 = sld [smem:[#allocation2 + $0x8]]  ;;  %s130_s9 = sshll.u32 %s268_s2, 4  ;;  %s131_s9 = int_to_ptr.hbm [resolvable:$true] %s130_s9 }
   0xf   :  { %s254_s20 = sld [smem:[#allocation2 + $0xc]] }
  0x10   :  { %s144_s21 = sld [smem:[#allocation2 + $0x2]] }
  0x11   :  { %s145_s1 = sld [smem:[#allocation2 + $0x3]] }
  0x12   :  { %v42_v2 = vstv %s41_s18  ;;  %s146_s22 = sld [smem:[#allocation2 + $0x9]] }
  0x13   :  { %v43_v3 = vmul.f32 %v42_v2, %v39_v0  ;;  %v45_v4 = vstv %s141_s19  ;;  %s256_s23 = sld [smem:[#allocation2 + $0xd]] }
  0x14   :  { %v46_v5 = vmul.f32 %v45_v4, %v40_v1  ;;  %s148_s24 = sld [smem:[#allocation2 + $0x4]]  ;;  %v49_v6 = vstv %s142_s0 }
  0x15   :  { %s149_s25 = sld [smem:[#allocation2 + $0x5]]  ;;  %v53_v17 = vstv %s254_s20 }
  0x16   :  { %v47_v7 = vadd.f32 %v46_v5, %v43_v3  ;;  %v57_v8 = vstv %s144_s21  ;;  %s150_s26 = sld [smem:[#allocation2 + $0xa]] }
  0x17   :  { %v58_v9 = vmul.f32 %v57_v8, %v39_v0  ;;  %v60_v10 = vstv %s145_s1  ;;  %s258_s27 = sld [smem:[#allocation2 + $0xe]] }
  0x18   :  { %v50_v11 = vadd.f32 %v49_v6, %v47_v7  ;;  %v61_v12 = vmul.f32 %v60_v10, %v40_v1  ;;  %s152_s28 = sld [smem:[#allocation2 + $0x6]]  ;;  %v64_v13 = vstv %s146_s22 }
  0x19   :  { %s153_s29 = sld [smem:[#allocation2 + $0x7]]  ;;  %v68_v22 = vstv %s256_s23 }
  0x1a   :  { %v51_v14 = vmax.f32 %v50_v11, 0.0  ;;  %v62_v15 = vadd.f32 %v61_v12, %v58_v9  ;;  %v72_v16 = vstv %s148_s24  ;;  %s154_s30 = sld [smem:[#allocation2 + $0xb]] }
  0x1b   :  { %v73_v18 = vmul.f32 %v72_v16, %v39_v0  ;;  %v75_v19 = vstv %s149_s25  ;;  %s155_s3 = sld [smem:[#allocation2 + $0xf]] }
  0x1c   :  { %v65_v20 = vadd.f32 %v64_v13, %v62_v15  ;;  %v76_v21 = vmul.f32 %v75_v19, %v40_v1  ;;  %v79_v23 = vstv %s150_s26  ;;  %v54_v24 = vmul.f32 %v53_v17, %v51_v14  ;;  %s156_s4 = sld [smem:[#allocation2 + $0x10]] }
  0x1d   :  { %v83_v33 = vstv %s258_s27 }
  0x1e   :  { %v66_v25 = vmax.f32 %v65_v20, 0.0  ;;  %v77_v26 = vadd.f32 %v76_v21, %v73_v18  ;;  %v87_v27 = vstv %s152_s28 }
  0x1f   :  { %v88_v28 = vmul.f32 %v87_v27, %v39_v0  ;;  %v90_v29 = vstv %s153_s29 }
  0x20   :  { %v69_v30 = vmul.f32 %v68_v22, %v66_v25  ;;  %v80_v31 = vadd.f32 %v79_v23, %v77_v26  ;;  %v91_v32 = vmul.f32 %v90_v29, %v40_v1  ;;  %v94_v34 = vstv %s154_s30 }
  0x21   :  { %v98_v40 = vstv %s155_s3 }
  0x22   :  { %v70_v35 = vadd.f32 %v69_v30, %v54_v24  ;;  %v81_v36 = vmax.f32 %v80_v31, 0.0  ;;  %v92_v37 = vadd.f32 %v91_v32, %v88_v28  ;;  %v102_v44 = vstv %s156_s4 }
  0x24   :  { %v84_v38 = vmul.f32 %v83_v33, %v81_v36  ;;  %v95_v39 = vadd.f32 %v94_v34, %v92_v37 }
  0x26   :  { %v85_v41 = vadd.f32 %v84_v38, %v70_v35  ;;  %v96_v42 = vmax.f32 %v95_v39, 0.0 }
  0x28   :  { %v99_v43 = vmul.f32 %v98_v40, %v96_v42 }
  0x2a   :  { %v100_v45 = vadd.f32 %v99_v43, %v85_v41 }
  0x2c   :  { %v103_v46 = vadd.f32 %v102_v44, %v100_v45 }
  0x2e   :  { %v104_v47 = vsub.f32 0.0, %v103_v46 }
  0x30   :  { %v105_v48 = vmul.f32 1.442695, %v104_v47 }
  0x32   :  { %160 = vpow2.f32 %v105_v48 }
  0x38   :  { %v161_v49 = vpop.eup %160 }
  0x39   :  { %v107_v50 = vadd.f32 1.0, %v161_v49 }
  0x3b   :  { %162 = vrcp.f32 %v107_v50  ;;  %v119_v53 = vand.u32 2147483648, %v107_v50  ;;  %vm113_vm0 = vweird.f32 %v107_v50  ;;  %v117_v55 = vand.u32 2147483647, %v107_v50 }
  0x3d   :  { %v120_v57 = vor.u32 1.1754944e-38, %v119_v53  ;;  %vm118_vm3 = vcmp.eq.f32.partialorder %v117_v55, 8.507059e+37 }
  0x41   :  { %v163_v51 = vpop.eup %162 }
  0x42   :  { %v109_v52 = vmul.f32 %v163_v51, %v107_v50  ;;  %vm114_vm1 = vweird.f32 %v163_v51 }
  0x43   :  { %vm115_vm2 = vmor %vm113_vm0, %vm114_vm1 }
  0x44   :  { %v110_v54 = vsub.f32 1.0, %v109_v52 }
  0x46   :  { %v111_v56 = vmul.f32 %v163_v51, %v110_v54 }
  0x48   :  { %v112_v58 = vadd.f32 %v163_v51, %v111_v56 }
  0x4a   :  { %v116_v59 = vsel %vm115_vm2, %v163_v51, %v112_v58 }
  0x4b   :  { %v121_v60 = vsel %vm118_vm3, %v120_v57, %v116_v59 }
  0x4c   :  { %122 = vst [vmem:[#allocation7] sm:$0x1] %v121_v60 }
  0x4d   :  { %133 = dma.vmem_to_hbm [thread:$0]  %s129_s6, 16, %s131_s9, [#allocation4]  }
  0x4e   :  { %228 = dma.done.wait [#allocation4], 16  }
  0x4f   :  { %229 = vsyncadd [#allocation4], 4294967280 }
  0x50   :  { %138 = vsyncpa [#allocation3], 1 }
  0x51   :  { %139 = vsyncpa [#allocation4], 1 }
  0x52   :  { %140 = vsyncpa [#allocation5], 1 }

</bundles_post_ra>
